<compile_context>
chip_gen: v5e
topology: v5e:2x2
jax: 0.10.0
libtpu: 0.0.40
codegen_flags: <defaults>
</compile_context>

<pallas_src>
import functools

import jax
import jax.numpy as jnp
from jax.experimental import pallas as pl
from jax.experimental.pallas import tpu as pltpu


def _round_up(v, m):
    return (v + m - 1) // m * m


# ---------------------------------------------------------------------------
# Pass 1: conv matmul + per-channel sum / sum-of-squares, accumulated over M.
# ---------------------------------------------------------------------------
def _conv_stats_kernel(x_ref, w_ref, sum_ref, ssq_ref):
    # x_ref: (tile_m, K) bf16, w_ref: (K, Cpad) bf16 -> f32 accumulation on the MXU.
    y = jnp.dot(x_ref[...], w_ref[...], preferred_element_type=jnp.float32)

    @pl.when(pl.program_id(0) == 0)
    def _init():
        sum_ref[...] = jnp.zeros_like(sum_ref)
        ssq_ref[...] = jnp.zeros_like(ssq_ref)

    # One traversal of y: sum and sum-of-squares (var = E[y^2] - mean^2 later).
    sum_ref[...] += jnp.sum(y, axis=0, keepdims=True)
    ssq_ref[...] += jnp.sum(y * y, axis=0, keepdims=True)


# ---------------------------------------------------------------------------
# Pass 2: conv matmul + folded BN affine + optional ReLU (independent per tile).
# ---------------------------------------------------------------------------
def _conv_bn_apply_kernel(x_ref, w_ref, sum_ref, ssq_ref, g_ref, b_ref, o_ref,
                          *, eps, apply_act, inv_m):
    y = jnp.dot(x_ref[...], w_ref[...], preferred_element_type=jnp.float32)

    # Finalize stats + fold affine once per tile on a (1, Cpad) row (negligible work).
    mean = sum_ref[...] * inv_m
    var = jnp.maximum(ssq_ref[...] * inv_m - mean * mean, 0.0)  # guard cancellation
    inv_std = jax.lax.rsqrt(var + eps)
    scale = g_ref[...] * inv_std
    shift = b_ref[...] - mean * scale

    out = y * scale + shift            # 2 VPU ops / element instead of 4
    if apply_act:
        out = jnp.maximum(out, 0.0)
    o_ref[...] = out.astype(o_ref.dtype)


# ---------------------------------------------------------------------------
# Wrapper
# ---------------------------------------------------------------------------
def conv_bn_act(x, weight, gamma, beta, *, stride=1, padding=0, dilation=1,
                groups=1, apply_act=True, eps=1e-5, tile_m=512):
    """x: (N, Cin, H, W) NCHW. weight: (Cout, Cin, kh, kw). Returns NCHW."""
    if groups != 1:
        raise NotImplementedError("groups != 1 is not supported")

    N, Cin, H, W = x.shape
    Cout, _, kh, kw = weight.shape
    out_dtype = x.dtype

    Hout = (H + 2 * padding - dilation * (kh - 1) - 1) // stride + 1
    Wout = (W + 2 * padding - dilation * (kw - 1) - 1) // stride + 1
    M = N * Hout * Wout
    K = Cin * kh * kw

    # ---- NHWC-style im2col (glue). For 1x1 convs this is just transpose+reshape. ----
    x_nhwc = jnp.transpose(x, (0, 2, 3, 1))                      # (N, H, W, Cin)
    if padding:
        x_nhwc = jnp.pad(x_nhwc,
                         ((0, 0), (padding, padding), (padding, padding), (0, 0)))
    cols = []
    for i in range(kh):
        for j in range(kw):
            hi, wj = i * dilation, j * dilation
            cols.append(x_nhwc[:, hi:hi + stride * Hout:stride,
                                  wj:wj + stride * Wout:stride, :])
    col = cols[0] if len(cols) == 1 else jnp.concatenate(cols, axis=-1)
    col = col.reshape(M, K)                                      # (M, K), K = kh*kw*Cin

    # weight (Cout, Cin, kh, kw) -> (kh, kw, Cin, Cout) -> (K, Cout): matches col's K order.
    wmat = jnp.transpose(weight, (2, 3, 1, 0)).reshape(K, Cout)

    # ---- Lane-dense channel padding + sublane-aligned M tiling ----------------------
    cpad = _round_up(Cout, 128)
    tm = min(_round_up(M, 8), _round_up(tile_m, 8))
    # Shrink the M tile if the double-buffered working set would blow VMEM (v7x: 64 MiB).
    while tm > 8 and 2 * (tm * K * 2 + tm * cpad * 4) > 24 * 1024 * 1024:
        tm = max(8, _round_up(tm // 2, 8))
    m_pad = _round_up(M, tm)
    num_m = m_pad // tm

    col = col.astype(jnp.bfloat16)
    if m_pad != M:
        # Zero rows contribute 0 to sum/sumsq -> stats with the true-M denominator stay exact.
        col = jnp.pad(col, ((0, m_pad - M), (0, 0)))
    wmat = jnp.pad(wmat, ((0, 0), (0, cpad - Cout))).astype(jnp.bfloat16)
    g = jnp.pad(gamma.astype(jnp.float32), (0, cpad - Cout)).reshape(1, cpad)
    b = jnp.pad(beta.astype(jnp.float32), (0, cpad - Cout)).reshape(1, cpad)

    # Explicit VMEM budget (matters most on v7x with 64 MiB physical VMEM).
    est = 2 * (tm * K * 2 + tm * cpad * 4 + K * cpad * 2) + 8 * cpad * 4
    vmem_limit = int(min(max(4 * est, 32 * 1024 * 1024), 48 * 1024 * 1024))

    x_spec = pl.BlockSpec((tm, K), lambda m: (m, 0))
    w_spec = pl.BlockSpec((K, cpad), lambda m: (0, 0))
    row_spec = pl.BlockSpec((1, cpad), lambda m: (0, 0))

    # ---- Pass 1: per-channel sum / sum-of-squares over the full M axis --------------
    ch_sum, ch_ssq = pl.pallas_call(
        _conv_stats_kernel,
        out_shape=[jax.ShapeDtypeStruct((1, cpad), jnp.float32),
                   jax.ShapeDtypeStruct((1, cpad), jnp.float32)],
        grid=(num_m,),
        in_specs=[x_spec, w_spec],
        out_specs=[row_spec, row_spec],
        compiler_params=pltpu.CompilerParams(
            dimension_semantics=("arbitrary",),       # resident accumulator across M tiles
            vmem_limit_bytes=vmem_limit),
    )(col, wmat)

    # ---- Pass 2: normalize + affine + ReLU, tile-parallel ---------------------------
    out = pl.pallas_call(
        functools.partial(_conv_bn_apply_kernel, eps=float(eps),
                          apply_act=apply_act, inv_m=1.0 / float(M)),
        out_shape=jax.ShapeDtypeStruct((m_pad, cpad), out_dtype),
        grid=(num_m,),
        in_specs=[x_spec, w_spec, row_spec, row_spec, row_spec, row_spec],
        out_specs=pl.BlockSpec((tm, cpad), lambda m: (m, 0)),
        compiler_params=pltpu.CompilerParams(
            dimension_semantics=("parallel",),        # megacore sharding on v7x
            vmem_limit_bytes=vmem_limit),
    )(col, wmat, ch_sum, ch_ssq, g, b)

    # Slice off pad, back to NCHW to match the PyTorch module's output layout.
    out = out[:M, :Cout].reshape(N, Hout, Wout, Cout)
    return jnp.transpose(out, (0, 3, 1, 2))


# ---------------------------------------------------------------------------
# Reference (plain JAX) for verification.
# ---------------------------------------------------------------------------
def _reference(x, weight, gamma, beta, *, stride=1, padding=0, dilation=1,
               apply_act=True, eps=1e-5):
    y = jax.lax.conv_general_dilated(
        x.astype(jnp.float32), weight.astype(jnp.float32),
        window_strides=(stride, stride),
        padding=[(padding, padding), (padding, padding)],
        rhs_dilation=(dilation, dilation),
        dimension_numbers=("NCHW", "OIHW", "NCHW"))
    mean = jnp.mean(y, axis=(0, 2, 3), keepdims=True)
    var = jnp.mean((y - mean) ** 2, axis=(0, 2, 3), keepdims=True)
    out = (y - mean) * jax.lax.rsqrt(var + eps)
    out = out * gamma.reshape(1, -1, 1, 1) + beta.reshape(1, -1, 1, 1)
    if apply_act:
        out = jnp.maximum(out, 0.0)
    return out


if __name__ == "__main__":
    # Module config: ConvBnAct(in_channels=4, out_channels=8)  (defaults: k=1, s=1, p=0)
    N, Cin, H, W = 2, 4, 16, 16
    Cout, kh, kw = 8, 1, 1

    key = jax.random.PRNGKey(0)
    kx, kw_ = jax.random.split(key, 2)

    x = jax.random.normal(kx, (N, Cin, H, W), dtype=jnp.float32)
    weight = jax.random.normal(kw_, (Cout, Cin, kh, kw), dtype=jnp.float32) * 0.1
    gamma = jnp.ones((Cout,), dtype=jnp.float32)   # BatchNorm2d default init
    beta = jnp.zeros((Cout,), dtype=jnp.float32)

    out = conv_bn_act(x, weight, gamma, beta, apply_act=True)
    out = jax.block_until_ready(out)
    assert out.shape == (N, Cout, H, W)

    # Matched-precision reference: conv operands rounded to bf16 like the MXU path.
    ref_bf16 = _reference(x.astype(jnp.bfloat16).astype(jnp.float32),
                          weight.astype(jnp.bfloat16).astype(jnp.float32),
                          gamma, beta, apply_act=True)
    assert jnp.allclose(out, ref_bf16, atol=2e-3, rtol=2e-3)

    # Full-f32 reference: loose bound, quantifies only the bf16 input rounding.
    ref_f32 = _reference(x, weight, gamma, beta, apply_act=True)
    assert jnp.allclose(out, ref_f32, atol=1e-1, rtol=1e-1)

    print("KERNEL_OK")
</pallas_src>

<mosaic_0001>
module attributes {stable_mosaic.version = 11 : i64} {
  func.func @_conv_stats_kernel(%arg0: i32, %arg1: memref<512x4xbf16, #tpu.memory_space<vmem>>, %arg2: memref<4x128xbf16, #tpu.memory_space<vmem>>, %arg3: memref<1x128xf32, #tpu.memory_space<vmem>>, %arg4: memref<1x128xf32, #tpu.memory_space<vmem>>) attributes {dimension_semantics = [#tpu.dimension_semantics<arbitrary>], iteration_bounds = array<i64: 1>, scalar_prefetch = 0 : i64, scratch_operands = 0 : i64, tpu.core_type = #tpu.core_type<tc>, window_params = [{transform_indices = @transform_0, window_bounds = array<i64: 512, 4>}, {pipeline_mode = #tpu.pipeline_mode<synchronous>, transform_indices = @transform_1, window_bounds = array<i64: 4, 128>}, {pipeline_mode = #tpu.pipeline_mode<synchronous>, transform_indices = @transform_2, window_bounds = array<i64: 1, 128>}, {pipeline_mode = #tpu.pipeline_mode<synchronous>, transform_indices = @transform_3, window_bounds = array<i64: 1, 128>}]} {
    %c0 = arith.constant 0 : index
    %c0_0 = arith.constant 0 : index
    %0 = vector.load %arg1[%c0, %c0_0] : memref<512x4xbf16, #tpu.memory_space<vmem>>, vector<512x4xbf16>
    %c0_1 = arith.constant 0 : index
    %c0_2 = arith.constant 0 : index
    %1 = vector.load %arg2[%c0_1, %c0_2] : memref<4x128xbf16, #tpu.memory_space<vmem>>, vector<4x128xbf16>
    %cst = arith.constant dense<0.000000e+00> : vector<512x128xf32>
    %2 = tpu.matmul %0, %1, %cst {dimension_numbers = #tpu.dot_dimension_numbers<[1], [0], [0], [1], [0, 0, 1, 1], [], []>} : vector<512x4xbf16>, vector<4x128xbf16>, vector<512x128xf32> -> vector<512x128xf32>
    %c0_i32 = arith.constant 0 : i32
    %3 = arith.cmpi eq, %arg0, %c0_i32 : i32
    %4 = arith.extui %3 : i1 to i32
    %c0_i32_3 = arith.constant 0 : i32
    %5 = arith.cmpi ne, %4, %c0_i32_3 : i32
    scf.if %5 {
      %cst_14 = arith.constant 0.000000e+00 : f32
      %17 = vector.broadcast %cst_14 : f32 to vector<1x128xf32>
      %c0_15 = arith.constant 0 : index
      %c0_16 = arith.constant 0 : index
      %18 = vector.load %arg3[%c0_15, %c0_16] : memref<1x128xf32, #tpu.memory_space<vmem>>, vector<1x128xf32>
      tpu.vector_store %arg3[%c0_15, %c0_16], %17 {strides = array<i32>} : memref<1x128xf32, #tpu.memory_space<vmem>>, vector<1x128xf32>,
      %cst_17 = arith.constant 0.000000e+00 : f32
      %19 = vector.broadcast %cst_17 : f32 to vector<1x128xf32>
      %c0_18 = arith.constant 0 : index
      %c0_19 = arith.constant 0 : index
      %20 = vector.load %arg4[%c0_18, %c0_19] : memref<1x128xf32, #tpu.memory_space<vmem>>, vector<1x128xf32>
      tpu.vector_store %arg4[%c0_18, %c0_19], %19 {strides = array<i32>} : memref<1x128xf32, #tpu.memory_space<vmem>>, vector<1x128xf32>,
    } else {
    }
    %c0_4 = arith.constant 0 : index
    %c0_5 = arith.constant 0 : index
    %6 = vector.load %arg3[%c0_4, %c0_5] : memref<1x128xf32, #tpu.memory_space<vmem>>, vector<1x128xf32>
    %cst_6 = arith.constant dense<0.000000e+00> : vector<128xf32>
    %7 = vector.multi_reduction <add>, %2, %cst_6 [0] : vector<512x128xf32> to vector<128xf32>
    %8 = vector.shape_cast %7 : vector<128xf32> to vector<1x128xf32>
    %9 = arith.addf %6, %8 : vector<1x128xf32>
    %c0_7 = arith.constant 0 : index
    %c0_8 = arith.constant 0 : index
    %10 = vector.load %arg3[%c0_7, %c0_8] : memref<1x128xf32, #tpu.memory_space<vmem>>, vector<1x128xf32>
    tpu.vector_store %arg3[%c0_7, %c0_8], %9 {strides = array<i32>} : memref<1x128xf32, #tpu.memory_space<vmem>>, vector<1x128xf32>,
    %c0_9 = arith.constant 0 : index
    %c0_10 = arith.constant 0 : index
    %11 = vector.load %arg4[%c0_9, %c0_10] : memref<1x128xf32, #tpu.memory_space<vmem>>, vector<1x128xf32>
    %12 = arith.mulf %2, %2 : vector<512x128xf32>
    %cst_11 = arith.constant dense<0.000000e+00> : vector<128xf32>
    %13 = vector.multi_reduction <add>, %12, %cst_11 [0] : vector<512x128xf32> to vector<128xf32>
    %14 = vector.shape_cast %13 : vector<128xf32> to vector<1x128xf32>
    %15 = arith.addf %11, %14 : vector<1x128xf32>
    %c0_12 = arith.constant 0 : index
    %c0_13 = arith.constant 0 : index
    %16 = vector.load %arg4[%c0_12, %c0_13] : memref<1x128xf32, #tpu.memory_space<vmem>>, vector<1x128xf32>
    tpu.vector_store %arg4[%c0_12, %c0_13], %15 {strides = array<i32>} : memref<1x128xf32, #tpu.memory_space<vmem>>, vector<1x128xf32>,
    return
  }
  func.func @transform_0(%arg0: i32) -> (i32, i32) {
    %c0_i32 = arith.constant 0 : i32
    %c0_i32_0 = arith.constant 0 : i32
    return %arg0, %c0_i32 : i32, i32
  }
  func.func @transform_1(%arg0: i32) -> (i32, i32) {
    %c0_i32 = arith.constant 0 : i32
    %c0_i32_0 = arith.constant 0 : i32
    %c0_i32_1 = arith.constant 0 : i32
    return %c0_i32, %c0_i32_0 : i32, i32
  }
  func.func @transform_2(%arg0: i32) -> (i32, i32) {
    %c0_i32 = arith.constant 0 : i32
    %c0_i32_0 = arith.constant 0 : i32
    %c0_i32_1 = arith.constant 0 : i32
    return %c0_i32, %c0_i32_0 : i32, i32
  }
  func.func @transform_3(%arg0: i32) -> (i32, i32) {
    %c0_i32 = arith.constant 0 : i32
    %c0_i32_0 = arith.constant 0 : i32
    %c0_i32_1 = arith.constant 0 : i32
    return %c0_i32, %c0_i32_0 : i32, i32
  }
}

</mosaic_0001>

<bundles_post_ra>
// kernel: tpu_custom_call.1
= control target key start
LH: loop header
LB: loop body
LE: loop exit
PB: predicated region body
PF: predicated region fallthrough
CT: control target
= control target key end

     0   :  { %9 = vsyncpa [#allocation3], 0  ;;  %vm338_vm0 = vcmask 1041408   ;;  %s1337_s0 = inlined_call_operand.vmem [shape: bf16[512,4], index: 0, kind: input, shape index: {}]   ;;  %s1338_s1 = inlined_call_operand.vmem [shape: bf16[4,128], index: 1, kind: input, shape index: {}]   ;;  %s1339_s2 = inlined_call_operand.hbm [shape: f32[1,128], index: 2, kind: output, shape index: {0}]   ;;  %s1340_s3 = inlined_call_operand.hbm [shape: f32[1,128], index: 3, kind: output, shape index: {1}]  }
   0x1   :  { %v80_v0 = vld [vmem:[%s1338_s1] sm:$0x3] }
   0x2   :  { %v340_v1 = vsel %vm338_vm0, %v80_v0, 0  ;;  %v917_v2 = vld [vmem:[%s1337_s0] sm:$0xff] }
   0x3   :  { %v925_v3 = vld [vmem:[%s1337_s0 + $0x40] sm:$0xff] }
   0x4   :  { %10 = vsyncpa [#allocation5], 0  ;;  %349 = vmatpush.bf16.msra.mxu0 %v340_v1  ;;  %vm241_vm1 = vcmask 31744   ;;  %949 = vmatpush.bf16.msra.mxu1 %v340_v1  ;;  %v918_v4 = vld [vmem:[%s1337_s0 + $0x8] sm:$0xff]  ;;  %v933_v6 = vld [vmem:[%s1337_s0 + $0x80] sm:$0xff]  ;;  %s732_s24 = sshll.u32 %s1339_s2, 4  ;;  %s733_s24 = int_to_ptr.hbm [resolvable:$true] %s732_s24 }
   0x5   :  { %950 = vmatpush.bf16.msra.mxu2 %v340_v1  ;;  %951 = vmatpush.bf16.msra.mxu3 %v340_v1  ;;  %v926_v5 = vld [vmem:[%s1337_s0 + $0x48] sm:$0xff]  ;;  %v919_v7 = vld [vmem:[%s1337_s0 + $0x10] sm:$0xff]  ;;  %v920_v10 = vld [vmem:[%s1337_s0 + $0x18] sm:$0xff]  ;;  %s1009_s25 = smov [#allocation4]   ;;  %s743_s29 = sshll.u32 %s1340_s3, 4  ;;  %s744_s29 = int_to_ptr.hbm [resolvable:$true] %s743_s29 }
   0x6   :  { %v927_v8 = vld [vmem:[%s1337_s0 + $0x50] sm:$0xff]  ;;  %v934_v9 = vld [vmem:[%s1337_s0 + $0x88] sm:$0xff]  ;;  %v928_v11 = vld [vmem:[%s1337_s0 + $0x58] sm:$0xff]  ;;  %s741_s26 = sshll.u32 %s1009_s25, 4  ;;  %s742_s26 = int_to_ptr.vmem [resolvable:$true] %s741_s26 }
   0x7   :  { %885 = vmatmul.msk.bf16.vlgmr.msra.gmra.mxu0 %vm241_vm1, %v917_v2  ;;  %893 = vmatmul.msk.bf16.vlgmr.msra.gmra.mxu1 %vm241_vm1, %v925_v3  ;;  %v935_v12 = vld [vmem:[%s1337_s0 + $0x90] sm:$0xff]  ;;  %v941_v13 = vld [vmem:[%s1337_s0 + $0xc0] sm:$0xff]  ;;  %v936_v16 = vld [vmem:[%s1337_s0 + $0x98] sm:$0xff] }
   0x8   :  { %901 = vmatmul.msk.bf16.vlgmr.msra.gmra.mxu2 %vm241_vm1, %v933_v6  ;;  %909 = vmatmul.msk.bf16.vlgmr.msra.gmra.mxu3 %vm241_vm1, %v941_v13  ;;  %v921_v14 = vld [vmem:[%s1337_s0 + $0x20] sm:$0xff]  ;;  %v942_v17 = vld [vmem:[%s1337_s0 + $0xc8] sm:$0xff]  ;;  %v943_v21 = vld [vmem:[%s1337_s0 + $0xd0] sm:$0xff] }
   0x9   :  { %v929_v15 = vld [vmem:[%s1337_s0 + $0x60] sm:$0xff]  ;;  %v922_v18 = vld [vmem:[%s1337_s0 + $0x28] sm:$0xff]  ;;  %v923_v22 = vld [vmem:[%s1337_s0 + $0x30] sm:$0xff] }
   0xa   :  { %v930_v19 = vld [vmem:[%s1337_s0 + $0x68] sm:$0xff]  ;;  %v937_v20 = vld [vmem:[%s1337_s0 + $0xa0] sm:$0xff]  ;;  %v931_v23 = vld [vmem:[%s1337_s0 + $0x70] sm:$0xff] }
   0xb   :  { %v938_v24 = vld [vmem:[%s1337_s0 + $0xa8] sm:$0xff]  ;;  %v944_v25 = vld [vmem:[%s1337_s0 + $0xd8] sm:$0xff]  ;;  %v939_v28 = vld [vmem:[%s1337_s0 + $0xb0] sm:$0xff] }
   0xc   :  { %v924_v26 = vld [vmem:[%s1337_s0 + $0x38] sm:$0xff]  ;;  %v945_v29 = vld [vmem:[%s1337_s0 + $0xe0] sm:$0xff]  ;;  %v946_v33 = vld [vmem:[%s1337_s0 + $0xe8] sm:$0xff] }
   0xd   :  { %v932_v27 = vld [vmem:[%s1337_s0 + $0x78] sm:$0xff]  ;;  %v947_v44 = vld [vmem:[%s1337_s0 + $0xf0] sm:$0xff] }
   0xe   :  { %v940_v32 = vld [vmem:[%s1337_s0 + $0xb8] sm:$0xff] }
   0xf   :  { %v948_v56 = vld [vmem:[%s1337_s0 + $0xf8] sm:$0xff]  ;;  %s1008_s0 = smov [#allocation2]  }
  0x10   :  { %s730_s21 = sshll.u32 %s1008_s0, 4  ;;  %s731_s21 = int_to_ptr.vmem [resolvable:$true] %s730_s21 }
  0x17   :  { %886 = vmatmul.msk.bf16.gmra.mxu0 %vm241_vm1, %v918_v4  ;;  %894 = vmatmul.msk.bf16.gmra.mxu1 %vm241_vm1, %v926_v5 }
  0x18   :  { %902 = vmatmul.msk.bf16.gmra.mxu2 %vm241_vm1, %v934_v9  ;;  %910 = vmatmul.msk.bf16.gmra.mxu3 %vm241_vm1, %v942_v17 }
  0x27   :  { %887 = vmatmul.msk.bf16.gmra.mxu0 %vm241_vm1, %v919_v7  ;;  %895 = vmatmul.msk.bf16.gmra.mxu1 %vm241_vm1, %v927_v8 }
  0x28   :  { %903 = vmatmul.msk.bf16.gmra.mxu2 %vm241_vm1, %v935_v12  ;;  %911 = vmatmul.msk.bf16.gmra.mxu3 %vm241_vm1, %v943_v21 }
  0x37   :  { %888 = vmatmul.msk.bf16.gmra.mxu0 %vm241_vm1, %v920_v10  ;;  %896 = vmatmul.msk.bf16.gmra.mxu1 %vm241_vm1, %v928_v11 }
  0x38   :  { %904 = vmatmul.msk.bf16.gmra.mxu2 %vm241_vm1, %v936_v16  ;;  %912 = vmatmul.msk.bf16.gmra.mxu3 %vm241_vm1, %v944_v25 }
  0x47   :  { %889 = vmatmul.msk.bf16.gmra.mxu0 %vm241_vm1, %v921_v14  ;;  %897 = vmatmul.msk.bf16.gmra.mxu1 %vm241_vm1, %v929_v15 }
  0x48   :  { %905 = vmatmul.msk.bf16.gmra.mxu2 %vm241_vm1, %v937_v20  ;;  %913 = vmatmul.msk.bf16.gmra.mxu3 %vm241_vm1, %v945_v29 }
  0x57   :  { %890 = vmatmul.msk.bf16.gmra.mxu0 %vm241_vm1, %v922_v18  ;;  %898 = vmatmul.msk.bf16.gmra.mxu1 %vm241_vm1, %v930_v19 }
  0x58   :  { %906 = vmatmul.msk.bf16.gmra.mxu2 %vm241_vm1, %v938_v24  ;;  %914 = vmatmul.msk.bf16.gmra.mxu3 %vm241_vm1, %v946_v33 }
  0x67   :  { %891 = vmatmul.msk.bf16.gmra.mxu0 %vm241_vm1, %v923_v22  ;;  %899 = vmatmul.msk.bf16.gmra.mxu1 %vm241_vm1, %v931_v23 }
  0x68   :  { %907 = vmatmul.msk.bf16.gmra.mxu2 %vm241_vm1, %v939_v28  ;;  %915 = vmatmul.msk.bf16.gmra.mxu3 %vm241_vm1, %v947_v44 }
  0x77   :  { %892 = vmatmul.msk.bf16.gmra.mxu0 %vm241_vm1, %v924_v26  ;;  %900 = vmatmul.msk.bf16.gmra.mxu1 %vm241_vm1, %v932_v27 }
  0x78   :  { %908 = vmatmul.msk.bf16.gmra.mxu2 %vm241_vm1, %v940_v32  ;;  %916 = vmatmul.msk.bf16.gmra.mxu3 %vm241_vm1, %v948_v56 }
  0x84   :  { %v351_v30 = vpop.f32.mrf.mxu0  ;;  %v1145_v31 = vpop.f32.mrf.mxu1 }
  0x85   :  { %v590_v35 = vmul.f32 %v351_v30, %v351_v30 }
  0x8b   :  { %v1165_v52 = vpop.f32.mrf.mxu2  ;;  %v1183_v3 = vpop.f32.mrf.mxu3 }
  0x8c   :  { %v353_v34 = vpop.f32.mrf.mxu0  ;;  %v1155_v38 = vpop.f32.mrf.mxu1 }
  0x8d   :  { %v518_v36 = vadd.f32 %v353_v34, %v351_v30  ;;  %v591_v37 = vmul.f32 %v353_v34, %v353_v34 }
  0x8f   :  { %v654_v39 = vadd.f32 %v591_v37, %v590_v35 }
  0x93   :  { %v1173_v59 = vpop.f32.mrf.mxu2  ;;  %v1189_v7 = vpop.f32.mrf.mxu3 }
  0x94   :  { %v356_v40 = vpop.f32.mrf.mxu0  ;;  %v1160_v45 = vpop.f32.mrf.mxu1 }
  0x95   :  { %v519_v41 = vadd.f32 %v518_v36, %v356_v40  ;;  %v592_v42 = vmul.f32 %v356_v40, %v356_v40 }
  0x97   :  { %v655_v43 = vadd.f32 %v654_v39, %v592_v42 }
  0x9b   :  { %v1177_v62 = vpop.f32.mrf.mxu2  ;;  %v1195_v11 = vpop.f32.mrf.mxu3 }
  0x9c   :  { %v358_v46 = vpop.f32.mrf.mxu0  ;;  %v1163_v50 = vpop.f32.mrf.mxu1 }
  0x9d   :  { %v520_v47 = vadd.f32 %v519_v41, %v358_v46  ;;  %v593_v48 = vmul.f32 %v358_v46, %v358_v46 }
  0x9f   :  { %v656_v49 = vadd.f32 %v655_v43, %v593_v48 }
  0xa3   :  { %v1181_v1 = vpop.f32.mrf.mxu2  ;;  %v1201_v15 = vpop.f32.mrf.mxu3 }
  0xa4   :  { %v361_v51 = vpop.f32.mrf.mxu0  ;;  %v1171_v58 = vpop.f32.mrf.mxu1 }
  0xa5   :  { %v521_v53 = vadd.f32 %v520_v47, %v361_v51  ;;  %v594_v54 = vmul.f32 %v361_v51, %v361_v51 }
  0xa7   :  { %v657_v55 = vadd.f32 %v656_v49, %v594_v54 }
  0xab   :  { %v1187_v6 = vpop.f32.mrf.mxu2  ;;  %v1207_v26 = vpop.f32.mrf.mxu3 }
  0xac   :  { %v363_v57 = vpop.f32.mrf.mxu0  ;;  %v1175_v61 = vpop.f32.mrf.mxu1 }
  0xad   :  { %v595_v17 = vmul.f32 %v363_v57, %v363_v57  ;;  %v522_v19 = vadd.f32 %v521_v53, %v363_v57 }
  0xaf   :  { %v658_v22 = vadd.f32 %v657_v55, %v595_v17 }
  0xb3   :  { %v1193_v10 = vpop.f32.mrf.mxu2  ;;  %v1213_v48 = vpop.f32.mrf.mxu3 }
  0xb4   :  { %v366_v60 = vpop.f32.mrf.mxu0  ;;  %v1179_v0 = vpop.f32.mrf.mxu1 }
  0xb5   :  { %v596_v20 = vmul.f32 %v366_v60, %v366_v60  ;;  %v523_v23 = vadd.f32 %v522_v19, %v366_v60 }
  0xb7   :  { %v659_v27 = vadd.f32 %v658_v22, %v596_v20 }
  0xbb   :  { %v1199_v14 = vpop.f32.mrf.mxu2 }
  0xbc   :  { %v368_v63 = vpop.f32.mrf.mxu0  ;;  %v1185_v4 = vpop.f32.mrf.mxu1 }
  0xbd   :  { %v597_v24 = vmul.f32 %v368_v63, %v368_v63  ;;  %v524_v28 = vadd.f32 %v523_v23, %v368_v63  ;;  %v607_v23 = vmul.f32 %v1155_v38, %v1155_v38 }
  0xbf   :  { %v660_v30 = vadd.f32 %v659_v27, %v597_v24  ;;  %v608_v27 = vmul.f32 %v1160_v45, %v1160_v45 }
  0xc3   :  { %v1205_v21 = vpop.f32.mrf.mxu2 }
  0xc4   :  { %v371_v2 = vpop.f32.mrf.mxu0  ;;  %v1191_v9 = vpop.f32.mrf.mxu1 }
  0xc5   :  { %v598_v29 = vmul.f32 %v371_v2, %v371_v2  ;;  %v525_v32 = vadd.f32 %v524_v28, %v371_v2 }
  0xc7   :  { %v661_v34 = vadd.f32 %v660_v30, %v598_v29  ;;  %v609_v30 = vmul.f32 %v1163_v50, %v1163_v50 }
  0xcb   :  { %v1211_v43 = vpop.f32.mrf.mxu2 }
  0xcc   :  { %v373_v5 = vpop.f32.mrf.mxu0  ;;  %v1197_v13 = vpop.f32.mrf.mxu1 }
  0xcd   :  { %v599_v33 = vmul.f32 %v373_v5, %v373_v5  ;;  %v526_v35 = vadd.f32 %v525_v32, %v373_v5 }
  0xcf   :  { %v662_v39 = vadd.f32 %v661_v34, %v599_v33  ;;  %v610_v34 = vmul.f32 %v1171_v58, %v1171_v58 }
  0xd3   :  { %v1215_v19 = vpop.f32.mrf.mxu2 }
  0xd4   :  { %v376_v8 = vpop.f32.mrf.mxu0  ;;  %v1203_v18 = vpop.f32.mrf.mxu1 }
  0xd5   :  { %v600_v36 = vmul.f32 %v376_v8, %v376_v8  ;;  %v527_v40 = vadd.f32 %v526_v35, %v376_v8 }
  0xd7   :  { %v663_v44 = vadd.f32 %v662_v39, %v600_v36  ;;  %v611_v39 = vmul.f32 %v1175_v61, %v1175_v61 }
  0xdb   :  { %v1234_v36 = vpop.f32.mrf.mxu2 }
  0xdc   :  { %v378_v12 = vpop.f32.mrf.mxu0  ;;  %v1209_v37 = vpop.f32.mrf.mxu1 }
  0xdd   :  { %v601_v41 = vmul.f32 %v378_v12, %v378_v12  ;;  %v528_v46 = vadd.f32 %v527_v40, %v378_v12  ;;  %v606_v12 = vmul.f32 %v1145_v31, %v1145_v31 }
  0xdf   :  { %v664_v49 = vadd.f32 %v663_v44, %v601_v41 }
  0xe4   :  { %v381_v16 = vpop.f32.mrf.mxu0  ;;  %v421_v2 = vpop.f32.mrf.mxu1 }
  0xe5   :  { %v602_v47 = vmul.f32 %v381_v16, %v381_v16  ;;  %v529_v51 = vadd.f32 %v528_v46, %v381_v16  ;;  %v1220_v16 = vpop.f32.mrf.mxu3 }
  0xe7   :  { %v665_v54 = vadd.f32 %v664_v49, %v602_v47  ;;  %v614_v49 = vmul.f32 %v1191_v9, %v1191_v9 }
  0xec   :  { %v383_v25 = vpop.f32.mrf.mxu0  ;;  %v423_v33 = vpop.f32.mrf.mxu1 }
  0xed   :  { %v603_v53 = vmul.f32 %v383_v25, %v383_v25  ;;  %v530_v55 = vadd.f32 %v529_v51, %v383_v25  ;;  %v1239_v41 = vpop.f32.mrf.mxu3 }
  0xef   :  { %v666_v57 = vadd.f32 %v665_v54, %v603_v53  ;;  %v615_v54 = vmul.f32 %v1197_v13, %v1197_v13 }
  0xf4   :  { %v386_v42 = vpop.f32.mrf.mxu0  ;;  %v426_v53 = vpop.f32.mrf.mxu1 }
  0xf5   :  { %v604_v56 = vmul.f32 %v386_v42, %v386_v42  ;;  %v531_v60 = vadd.f32 %v530_v55, %v386_v42 }
  0xf7   :  { %v667_v5 = vadd.f32 %v666_v57, %v604_v56  ;;  %v616_v57 = vmul.f32 %v1203_v18, %v1203_v18 }
  0xfc   :  { %v388_v63 = vpop.f32.mrf.mxu0 }
  0xfd   :  { %v532_v8 = vadd.f32 %v531_v60, %v388_v63  ;;  %v605_v17 = vmul.f32 %v388_v63, %v388_v63  ;;  %v1256_v63 = vpop.f32.mrf.mxu3 }
  0xff   :  { %v533_v20 = vadd.f32 %v532_v8, %v1145_v31  ;;  %v668_v22 = vadd.f32 %v667_v5, %v605_v17 }
 0x101   :  { %v534_v24 = vadd.f32 %v533_v20, %v1155_v38  ;;  %v669_v25 = vadd.f32 %v668_v22, %v606_v12  ;;  %v618_v12 = vmul.f32 %v421_v2, %v421_v2 }
 0x103   :  { %v535_v28 = vadd.f32 %v534_v24, %v1160_v45  ;;  %v670_v29 = vadd.f32 %v669_v25, %v607_v23  ;;  %v619_v23 = vmul.f32 %v423_v33, %v423_v33  ;;  %v428_v24 = vpop.f32.mrf.mxu1 }
 0x105   :  { %v536_v31 = vadd.f32 %v535_v28, %v1163_v50  ;;  %v671_v32 = vadd.f32 %v670_v29, %v608_v27  ;;  %v612_v50 = vmul.f32 %v1179_v0, %v1179_v0  ;;  %v620_v28 = vmul.f32 %v426_v53, %v426_v53 }
 0x107   :  { %v537_v35 = vadd.f32 %v536_v31, %v1171_v58  ;;  %v672_v38 = vadd.f32 %v671_v32, %v609_v30  ;;  %v613_v58 = vmul.f32 %v1185_v4, %v1185_v4  ;;  %v621_v31 = vmul.f32 %v428_v24, %v428_v24  ;;  %v1261_v32 = vpop.f32.mrf.mxu3 }
 0x109   :  { %v538_v45 = vadd.f32 %v537_v35, %v1175_v61  ;;  %v673_v40 = vadd.f32 %v672_v38, %v610_v34  ;;  %v623_v35 = vmul.f32 %v1173_v59, %v1173_v59 }
 0x10b   :  { %v674_v42 = vadd.f32 %v673_v40, %v611_v39  ;;  %v539_v44 = vadd.f32 %v538_v45, %v1179_v0  ;;  %v458_v0 = vpop.f32.mrf.mxu2  ;;  %v624_v39 = vmul.f32 %v1177_v62, %v1177_v62 }
 0x10d   :  { %v540_v46 = vadd.f32 %v539_v44, %v1185_v4  ;;  %v675_v47 = vadd.f32 %v674_v42, %v612_v50  ;;  %v625_v50 = vmul.f32 %v1181_v1, %v1181_v1 }
 0x10f   :  { %v541_v61 = vadd.f32 %v540_v46, %v1191_v9  ;;  %v676_v51 = vadd.f32 %v675_v47, %v613_v58  ;;  %v617_v9 = vmul.f32 %v1209_v37, %v1209_v37  ;;  %v626_v58 = vmul.f32 %v1187_v6, %v1187_v6  ;;  %v1278_v47 = vpop.f32.mrf.mxu3 }
 0x111   :  { %v542_v55 = vadd.f32 %v541_v61, %v1197_v13  ;;  %v677_v56 = vadd.f32 %v676_v51, %v614_v49  ;;  %v627_v49 = vmul.f32 %v1193_v10, %v1193_v10  ;;  %v628_v51 = vmul.f32 %v1199_v14, %v1199_v14 }
 0x113   :  { %v543_v4 = vadd.f32 %v542_v55, %v1203_v18  ;;  %v678_v60 = vadd.f32 %v677_v56, %v615_v54  ;;  %v461_v18 = vpop.f32.mrf.mxu2  ;;  %v629_v54 = vmul.f32 %v1205_v21, %v1205_v21  ;;  %v630_v56 = vmul.f32 %v1211_v43, %v1211_v43 }
 0x115   :  { %v544_v5 = vadd.f32 %v543_v4, %v1209_v37  ;;  %v679_v8 = vadd.f32 %v678_v60, %v616_v57  ;;  %v622_v37 = vmul.f32 %v1165_v52, %v1165_v52  ;;  %v631_v60 = vmul.f32 %v1215_v19, %v1215_v19 }
 0x117   :  { %v545_v17 = vadd.f32 %v544_v5, %v421_v2  ;;  %v680_v20 = vadd.f32 %v679_v8, %v617_v9  ;;  %v632_v8 = vmul.f32 %v1234_v36, %v1234_v36 }
 0x119   :  { %v681_v13 = vadd.f32 %v680_v20, %v618_v12  ;;  %v546_v22 = vadd.f32 %v545_v17, %v423_v33  ;;  %v633_v20 = vmul.f32 %v458_v0, %v458_v0 }
 0x11b   :  { %v682_v25 = vadd.f32 %v681_v13, %v619_v23  ;;  %v547_v27 = vadd.f32 %v546_v22, %v426_v53  ;;  %v634_v23 = vmul.f32 %v461_v18, %v461_v18 }
 0x11d   :  { %v683_v29 = vadd.f32 %v682_v25, %v620_v28  ;;  %v548_v30 = vadd.f32 %v547_v27, %v428_v24 }
 0x11f   :  { %v549_v34 = vadd.f32 %v548_v30, %v1165_v52  ;;  %v684_v2 = vadd.f32 %v683_v29, %v621_v31  ;;  %v463_v52 = vpop.f32.mrf.mxu2 }
 0x120   :  { %v635_v27 = vmul.f32 %v463_v52, %v463_v52 }
 0x121   :  { %v550_v33 = vadd.f32 %v549_v34, %v1173_v59  ;;  %v685_v38 = vadd.f32 %v684_v2, %v622_v37 }
 0x123   :  { %v551_v45 = vadd.f32 %v550_v33, %v1177_v62  ;;  %v686_v40 = vadd.f32 %v685_v38, %v623_v35 }
 0x125   :  { %v552_v42 = vadd.f32 %v551_v45, %v1181_v1  ;;  %v687_v44 = vadd.f32 %v686_v40, %v624_v39  ;;  %v640_v39 = vmul.f32 %v1195_v11, %v1195_v11 }
 0x127   :  { %v553_v46 = vadd.f32 %v552_v42, %v1187_v6  ;;  %v688_v59 = vadd.f32 %v687_v44, %v625_v50  ;;  %v1007_v50 = vmov 0.0   ;;  %v641_v42 = vmul.f32 %v1201_v15, %v1201_v15 }
 0x128   :  { %515 = vst [vmem:[#allocation2] sm:$0x1] %v1007_v50 }
 0x129   :  { %v554_v62 = vadd.f32 %v553_v46, %v1193_v10  ;;  %v689_v61 = vadd.f32 %v688_v59, %v626_v58  ;;  %v466_v10 = vpop.f32.mrf.mxu2  ;;  %516 = vst [vmem:[#allocation4] sm:$0x1] %v1007_v50 }
 0x12a   :  { %v636_v30 = vmul.f32 %v466_v10, %v466_v10 }
 0x12b   :  { %v690_v1 = vadd.f32 %v689_v61, %v627_v49  ;;  %v555_v53 = vadd.f32 %v554_v62, %v1199_v14  ;;  %v498_v14 = vpop.f32.mrf.mxu3  ;;  %v644_v62 = vmul.f32 %v1220_v16, %v1220_v16 }
 0x12d   :  { %v556_v6 = vadd.f32 %v555_v53, %v1205_v21  ;;  %v691_v55 = vadd.f32 %v690_v1, %v628_v51  ;;  %v645_v51 = vmul.f32 %v1239_v41, %v1239_v41 }
 0x12f   :  { %v557_v57 = vadd.f32 %v556_v6, %v1211_v43  ;;  %v692_v4 = vadd.f32 %v691_v55, %v629_v54  ;;  %v647_v55 = vmul.f32 %v1261_v32, %v1261_v32 }
 0x131   :  { %v558_v9 = vadd.f32 %v557_v57, %v1215_v19  ;;  %v693_v5 = vadd.f32 %v692_v4, %v630_v56  ;;  %v468_v28 = vpop.f32.mrf.mxu2 }
 0x132   :  { %v637_v2 = vmul.f32 %v468_v28, %v468_v28 }
 0x133   :  { %v559_v21 = vadd.f32 %v558_v9, %v1234_v36  ;;  %v694_v17 = vadd.f32 %v693_v5, %v631_v60  ;;  %v501_v31 = vpop.f32.mrf.mxu3  ;;  %v638_v36 = vmul.f32 %v1183_v3, %v1183_v3  ;;  %v649_v60 = vmul.f32 %v498_v14, %v498_v14 }
 0x135   :  { %v560_v12 = vadd.f32 %v559_v21, %v458_v0  ;;  %v695_v13 = vadd.f32 %v694_v17, %v632_v8 }
 0x137   :  { %v696_v22 = vadd.f32 %v695_v13, %v633_v20  ;;  %v561_v43 = vadd.f32 %v560_v12, %v461_v18  ;;  %v639_v18 = vmul.f32 %v1189_v7, %v1189_v7 }
 0x139   :  { %v697_v24 = vadd.f32 %v696_v22, %v634_v23  ;;  %v562_v25 = vadd.f32 %v561_v43, %v463_v52 }
 0x13b   :  { %v698_v29 = vadd.f32 %v697_v24, %v635_v27  ;;  %v563_v19 = vadd.f32 %v562_v25, %v466_v10  ;;  %v503_v52 = vpop.f32.mrf.mxu3 }
 0x13c   :  { %v651_v12 = vmul.f32 %v503_v52, %v503_v52 }
 0x13d   :  { %v699_v37 = vadd.f32 %v698_v29, %v636_v30  ;;  %v564_v34 = vadd.f32 %v563_v19, %v468_v28 }
 0x13f   :  { %v565_v0 = vadd.f32 %v564_v34, %v1183_v3  ;;  %v700_v35 = vadd.f32 %v699_v37, %v637_v2  ;;  %v517_v34 = vld [vmem:[#allocation2] sm:$0x1] }
 0x141   :  { %v566_v33 = vadd.f32 %v565_v0, %v1189_v7  ;;  %v701_v38 = vadd.f32 %v700_v35, %v638_v36  ;;  %v642_v7 = vmul.f32 %v1207_v26, %v1207_v26  ;;  %v589_v0 = vld [vmem:[#allocation4] sm:$0x1] }
 0x143   :  { %v567_v45 = vadd.f32 %v566_v33, %v1195_v11  ;;  %v702_v40 = vadd.f32 %v701_v38, %v639_v18  ;;  %v643_v11 = vmul.f32 %v1213_v48, %v1213_v48 }
 0x145   :  { %v568_v3 = vadd.f32 %v567_v45, %v1201_v15  ;;  %v703_v44 = vadd.f32 %v702_v40, %v640_v39 }
 0x147   :  { %v569_v58 = vadd.f32 %v568_v3, %v1207_v26  ;;  %v704_v46 = vadd.f32 %v703_v44, %v641_v42  ;;  %v646_v26 = vmul.f32 %v1256_v63, %v1256_v63 }
 0x149   :  { %v570_v59 = vadd.f32 %v569_v58, %v1213_v48  ;;  %v705_v49 = vadd.f32 %v704_v46, %v642_v7  ;;  %v506_v48 = vpop.f32.mrf.mxu3 }
 0x14b   :  { %v706_v61 = vadd.f32 %v705_v49, %v643_v11  ;;  %v571_v15 = vadd.f32 %v570_v59, %v1220_v16  ;;  %v648_v16 = vmul.f32 %v1278_v47, %v1278_v47 }
 0x14d   :  { %v572_v1 = vadd.f32 %v571_v15, %v1239_v41  ;;  %v707_v53 = vadd.f32 %v706_v61, %v644_v62 }
 0x14f   :  { %v573_v54 = vadd.f32 %v572_v1, %v1256_v63  ;;  %v708_v6 = vadd.f32 %v707_v53, %v645_v51  ;;  %v650_v63 = vmul.f32 %v501_v31, %v501_v31 }
 0x151   :  { %v574_v56 = vadd.f32 %v573_v54, %v1261_v32  ;;  %v709_v57 = vadd.f32 %v708_v6, %v646_v26  ;;  %v508_v20 = vpop.f32.mrf.mxu3  ;;  %v652_v32 = vmul.f32 %v506_v48, %v506_v48 }
 0x152   :  { %v653_v24 = vmul.f32 %v508_v20, %v508_v20 }
 0x153   :  { %v575_v4 = vadd.f32 %v574_v56, %v1278_v47  ;;  %v710_v41 = vadd.f32 %v709_v57, %v647_v55 }
 0x155   :  { %v576_v10 = vadd.f32 %v575_v4, %v498_v14  ;;  %v711_v9 = vadd.f32 %v710_v41, %v648_v16 }
 0x157   :  { %v712_v5 = vadd.f32 %v711_v9, %v649_v60  ;;  %v577_v8 = vadd.f32 %v576_v10, %v501_v31 }
 0x159   :  { %v713_v21 = vadd.f32 %v712_v5, %v650_v63  ;;  %v578_v17 = vadd.f32 %v577_v8, %v503_v52 }
 0x15b   :  { %v714_v13 = vadd.f32 %v713_v21, %v651_v12  ;;  %v579_v22 = vadd.f32 %v578_v17, %v506_v48 }
 0x15d   :  { %v715_v43 = vadd.f32 %v714_v13, %v652_v32  ;;  %v580_v23 = vadd.f32 %v579_v22, %v508_v20 }
 0x15f   :  { %v581_v25 = vrot.slane %v580_v23, 4  ;;  %v716_v27 = vadd.f32 %v715_v43, %v653_v24 }
 0x161   :  { %v582_v47 = vadd.f32 %v581_v25, %v580_v23  ;;  %v717_v28 = vrot.slane %v716_v27, 4 }
 0x163   :  { %v583_v29 = vrot.slane %v582_v47, 2  ;;  %v718_v14 = vadd.f32 %v717_v28, %v716_v27 }
 0x165   :  { %v584_v19 = vadd.f32 %v583_v29, %v582_v47  ;;  %v719_v30 = vrot.slane %v718_v14, 2 }
 0x167   :  { %v585_v37 = vrot.slane %v584_v19, 1  ;;  %v720_v31 = vadd.f32 %v719_v30, %v718_v14 }
 0x169   :  { %v586_v2 = vadd.f32 %v585_v37, %v584_v19  ;;  %v721_v36 = vrot.slane %v720_v31, 1 }
 0x16b   :  { %v722_v35 = vadd.f32 %v721_v36, %v720_v31  ;;  %v587_v18 = vadd.f32 %v586_v2, %v517_v34 }
 0x16d   :  { %588 = vst [vmem:[#allocation2] sm:$0x1] %v587_v18  ;;  %v723_v33 = vadd.f32 %v722_v35, %v589_v0 }
 0x16e   :  { %735 = dma.vmem_to_hbm [thread:$0]  %s731_s21, 16, %s733_s24, [#allocation3]  }
 0x16f   :  { %724 = vst [vmem:[#allocation4] sm:$0x1] %v723_v33 }
 0x170   :  { %746 = dma.vmem_to_hbm [thread:$0]  %s742_s26, 16, %s744_s29, [#allocation5]  }
 0x171   :  { %1003 = dma.done.wait [#allocation3], 16  }
 0x172   :  { %1004 = vsyncadd [#allocation3], 4294967280 }
 0x173   :  { %1005 = dma.done.wait [#allocation5], 16  }
 0x174   :  { %1006 = vsyncadd [#allocation5], 4294967280 }
 0x175   :  { %755 = vsyncpa [#allocation3], 1 }
 0x176   :  { %756 = vsyncpa [#allocation5], 1 }

</bundles_post_ra>
